<compile_context>
chip_gen: v6e
topology: v6e:2x2x1
jax: 0.10.0
libtpu: 0.0.40
codegen_flags: <defaults>
</compile_context>

<pallas_src>
import numpy as np
import jax
import jax.numpy as jnp
from jax.experimental import pallas as pl
from jax.experimental.pallas import tpu as pltpu

EPS = 0.0001
BN_EPS = 1e-5


# ----------------------------------------------------------------------------
# One-time probe: determine pltpu.roll's rotation convention on this backend.
# ----------------------------------------------------------------------------
def _probe_roll_sign():
    x = jnp.arange(8 * 128, dtype=jnp.float32).reshape(8, 128)

    def k(x_ref, o_ref):
        o_ref[...] = pltpu.roll(x_ref[...], 3, axis=1)

    y = pl.pallas_call(k, out_shape=jax.ShapeDtypeStruct((8, 128), jnp.float32))(x)
    if bool(jnp.array_equal(y, jnp.roll(x, 3, axis=1))):
        return 1          # pltpu.roll(x, s)[j] == x[j - s]  (jnp.roll convention)
    if bool(jnp.array_equal(y, jnp.roll(x, -3, axis=1))):
        return -1         # opposite convention
    return 1              # should not happen


# ----------------------------------------------------------------------------
# Fused whole-network Pallas kernel
# ----------------------------------------------------------------------------
def make_stgcn_kernel(meta, NM, roll_sign):
    """Ref order: x2d, dbn_scale, dbn_shift,
       per block: a_stack(3D), gcn_w, gcn_shift, tcn_w, tcn_shift, masks(3D),
                  [stride_sel]  (stride>1 only),
       head: wmap, bvec, then the single output ref."""

    def kernel(*refs):
        o_ref = refs[-1]
        # data_bn ('VC', inference) as a fused elementwise affine
        x = refs[0][...] * refs[1][...] + refs[2][...]
        idx = 3
        for blk in meta:
            K, Co = blk['K'], blk['Co']
            V, Tin = blk['V'], blk['Tin']
            stride, res = blk['stride'], blk['res']
            taps = blk['taps']
            TV = Tin * V

            a_ref = refs[idx]
            wg_ref = refs[idx + 1]
            gsh_ref = refs[idx + 2]
            wt_ref = refs[idx + 3]
            tsh_ref = refs[idx + 4]
            msk_ref = refs[idx + 5]
            idx += 6
            if stride > 1:
                sdn_ref = refs[idx]
                idx += 1

            # ---- unit_gcn -------------------------------------------------
            if blk['gcn_mode'] == 'stacked':
                # aggregate-first (cheap: Ci rows), stack the K aggregated copies,
                # then ONE deep 1x1-conv matmul (BN scale folded into the weight).
                xa = jnp.concatenate(
                    [jnp.dot(x, a_ref[k], preferred_element_type=jnp.float32)
                     for k in range(K)], axis=0)
                z = jnp.dot(wg_ref[...], xa, preferred_element_type=jnp.float32)
            else:
                # conv-first fallback (NM*Ci not sublane aligned, first block only)
                nmco = NM * Co
                y = jnp.dot(wg_ref[...], x, preferred_element_type=jnp.float32)
                z = jnp.dot(y[0:nmco, :], a_ref[0], preferred_element_type=jnp.float32)
                for k in range(1, K):
                    z = z + jnp.dot(y[k * nmco:(k + 1) * nmco, :], a_ref[k],
                                    preferred_element_type=jnp.float32)
            g = jnp.maximum(z + gsh_ref[...], 0.0)                  # (NM*Co, Tin*V)

            # ---- unit_tcn (9,1) + conv residual, fused --------------------
            # im2col over temporal taps via XLU rolls + boundary masks, then one
            # deep matmul (tap sum + channel mix + residual conv in the MXU).
            pieces = []
            for mi, (d, needs_mask) in enumerate(taps):
                if d == 0:
                    p = g
                else:
                    shift = ((-d * roll_sign) * V) % TV
                    p = pltpu.roll(g, shift, axis=1)
                if needs_mask:
                    p = p * msk_ref[mi]
                pieces.append(p)
            if res == 'conv':
                pieces.append(x)
            gs = jnp.concatenate(pieces, axis=0)
            t = jnp.dot(wt_ref[...], gs, preferred_element_type=jnp.float32) + tsh_ref[...]
            if stride > 1:
                t = jnp.dot(t, sdn_ref[...], preferred_element_type=jnp.float32)
            if res == 'identity':
                t = t + x
            x = jnp.maximum(t, 0.0)                                 # (NM*Co, Tout*V)

        # ---- head: global avg pool over (M, T, V) + fc (scale folded in wmap)
        wmap = refs[idx][...]
        bvec = refs[idx + 1][...]
        proj = jnp.dot(wmap, x, preferred_element_type=jnp.float32)  # (N*ncls, TVf)
        o_ref[...] = jnp.sum(proj, axis=1, keepdims=True) + bvec     # (N*ncls, 1)

    return kernel


# ----------------------------------------------------------------------------
# Offline parameter folding / restructuring helpers (one-time, wrapper side)
# ----------------------------------------------------------------------------
def bn_scale_shift(bn):
    scale = np.asarray(bn['gamma'], np.float32) / np.sqrt(np.asarray(bn['var'], np.float32) + BN_EPS)
    shift = np.asarray(bn['beta'], np.float32) - np.asarray(bn['mean'], np.float32) * scale
    return scale, shift


def _blockdiag(w2, NM):
    # (Co, Ci) -> (NM*Co, NM*Ci): rows (sample, out_ch), cols (sample, in_ch)
    Co, Ci = w2.shape
    return np.einsum('oc,nm->nomc', w2, np.eye(NM, dtype=np.float32)).reshape(NM * Co, NM * Ci)


def _build_stride_sel(Tin, Tout, V, stride):
    # kernel-size-1 strided selection: out time to <- in time stride*to
    sel = np.zeros((Tin, Tout), np.float32)
    for to in range(Tout):
        sel[stride * to, to] = 1.0
    return np.einsum('tp,uv->tupv', sel, np.eye(V, dtype=np.float32)).reshape(Tin * V, Tout * V)


def build_fused_stgcn(params, N, M, T, V, C, num_classes):
    """Precompute (once) all folded parameter arrays and return a jitted forward(x)
    that launches a single fused Pallas kernel."""
    NM = N * M
    A = np.asarray(params['A'], np.float32)
    K = int(A.shape[0])
    roll_sign = _probe_roll_sign()

    # data_bn ('VC'): channel index v*C + c -> per-(c,v) affine tiled to (NM*C, T*V)
    dsc_vec, dsh_vec = bn_scale_shift(params['data_bn'])
    dsc_cv = dsc_vec.reshape(V, C).T
    dsh_cv = dsh_vec.reshape(V, C).T
    folded = [np.tile(dsc_cv, (NM, T)), np.tile(dsh_cv, (NM, T))]
    meta = []

    Tin = T
    for blk in params['blocks']:
        Ci, Co, stride = int(blk['in_c']), int(blk['out_c']), int(blk['stride'])
        Tout = (Tin - 1) // stride + 1
        A_eff = A * np.asarray(blk['gcn_PA'], np.float32)           # adaptive='importance'
        g_sc, g_sh = bn_scale_shift(blk['gcn_bn'])
        w3 = np.asarray(blk['gcn_w'], np.float32).reshape(K, Co, Ci)

        # graph aggregation, block-diagonal over time: (K, Tin*V, Tin*V)
        a_stack = np.einsum('tp,kuv->ktupv', np.eye(Tin, dtype=np.float32),
                            A_eff).reshape(K, Tin * V, Tin * V)

        # 1x1 conv weight with BN scale folded; layout picked by sublane alignment
        w3s = w3 * g_sc[None, :, None]
        if (NM * Ci) % 8 == 0:
            gcn_mode = 'stacked'
            wg = np.einsum('koc,nm->nokmc', w3s, np.eye(NM, dtype=np.float32)
                           ).reshape(NM * Co, K * NM * Ci)
        else:
            gcn_mode = 'convfirst'
            wg = np.einsum('koc,nm->knomc', w3s, np.eye(NM, dtype=np.float32)
                           ).reshape(K * NM * Co, NM * Ci)

        colsum = A_eff.sum(axis=1)                                   # (K, V)
        bias_agg = np.einsum('kc,kv->cv',
                             np.asarray(blk['gcn_b'], np.float32).reshape(K, Co), colsum)
        gshift_cv = bias_agg * g_sc[:, None] + g_sh[:, None]         # conv bias + BN folded
        gshift = np.tile(gshift_cv, (NM, Tin))                       # (NM*Co, Tin*V)

        # unit_tcn (+ optional conv residual), folded into one weight matrix
        tcn_w = np.asarray(blk['tcn_w'], np.float32)                 # (KT, Co, Co)
        KT = int(tcn_w.shape[0])
        pad = (KT - 1) // 2
        t_sc, t_sh = bn_scale_shift(blk['tcn_bn'])

        taps, masks, wt_cols = [], [], []
        for kt in range(KT):
            d = kt - pad
            lo, hi = max(0, -d), min(Tin, Tin - d)
            if lo >= hi:
                continue                                             # tap never valid: drop it
            m = np.zeros((1, Tin * V), np.float32)
            m[0, lo * V:hi * V] = 1.0
            taps.append((d, not (lo == 0 and hi == Tin)))
            masks.append(m)
            wt_cols.append(_blockdiag(tcn_w[kt] * t_sc[:, None], NM))
        tshift_c = np.asarray(blk['tcn_b'], np.float32) * t_sc + t_sh

        if not blk['residual']:
            res_type = 'none'
        elif 'res_w' in blk:
            res_type = 'conv'
            r_sc, r_sh = bn_scale_shift(blk['res_bn'])
            wr = np.asarray(blk['res_w'], np.float32)[0] * r_sc[:, None]
            wt_cols.append(_blockdiag(wr, NM))
            tshift_c = tshift_c + np.asarray(blk['res_b'], np.float32) * r_sc + r_sh
        else:
            res_type = 'identity'

        wt = np.concatenate(wt_cols, axis=1)                         # (NM*Co, nT*NM*Co[+NM*Ci])
        tshift = np.tile(tshift_c[:, None], (NM, 1))                 # (NM*Co, 1)
        mask_arr = np.stack(masks, axis=0)                           # (nT, 1, Tin*V)

        folded += [a_stack, wg, gshift, wt, tshift, mask_arr]
        if stride > 1:
            folded.append(_build_stride_sel(Tin, Tout, V, stride))

        meta.append(dict(K=K, Co=Co, Ci=Ci, V=V, Tin=Tin, stride=stride,
                         res=res_type, gcn_mode=gcn_mode, taps=taps))
        Tin = Tout

    # --- head folds: 1/(M*T*V) pooling scale absorbed into the fc weight; person-mean
    #     and per-clip selection expressed as one (N*ncls, NM*Cf) matrix.
    Cf = int(params['blocks'][-1]['out_c'])
    TVf = Tin * V
    ncls = num_classes
    fc_w = np.asarray(params['fc_w'], np.float32) / float(M * TVf)   # (ncls, Cf)
    wmap = np.einsum('nq,kc->nkqc', np.eye(N, dtype=np.float32), fc_w)
    wmap = np.broadcast_to(wmap[:, :, :, None, :], (N, ncls, N, M, Cf)).reshape(N * ncls, NM * Cf)
    bvec = np.tile(np.asarray(params['fc_b'], np.float32), (N,)).reshape(N * ncls, 1)
    folded += [np.ascontiguousarray(wmap), bvec]

    folded = [jnp.asarray(a, jnp.float32) for a in folded]

    kernel = make_stgcn_kernel(meta, NM, roll_sign)
    fused_call = pl.pallas_call(
        kernel,
        out_shape=jax.ShapeDtypeStruct((N * ncls, 1), jnp.float32),
        compiler_params=pltpu.CompilerParams(vmem_limit_bytes=32 * 1024 * 1024),
    )

    @jax.jit
    def forward(x):
        # (N, M, T, V, C) -> (NM*C, T*V): samples/channels on sublanes, T*V on lanes
        x2d = jnp.transpose(x, (0, 1, 4, 2, 3)).reshape(NM * C, T * V)
        out = fused_call(x2d, *folded)
        return out.reshape(N, ncls)

    return forward


# ----------------------------------------------------------------------------
# Parameters / graph (deterministic, in-script)
# ----------------------------------------------------------------------------
def build_graph_A(num_node):
    I = jnp.eye(num_node, dtype=jnp.float32)
    inward = jnp.zeros((num_node, num_node), dtype=jnp.float32)
    for i in range(1, num_node):
        inward = inward.at[i, i - 1].set(1.0)    # child -> parent
    outward = inward.T

    def norm(adj):
        d = adj.sum(axis=0)
        dinv = jnp.where(d > 0, 1.0 / d, 0.0)
        return adj * dinv[None, :]

    return jnp.stack([norm(I), norm(inward), norm(outward)])         # (3, V, V)


def bn_init(key, c):
    k1, k2, k3, k4 = jax.random.split(key, 4)
    return dict(
        gamma=1.0 + 0.1 * jax.random.normal(k1, (c,), jnp.float32),
        beta=0.1 * jax.random.normal(k2, (c,), jnp.float32),
        mean=0.1 * jax.random.normal(k3, (c,), jnp.float32),
        var=1.0 + 0.1 * jax.random.uniform(k4, (c,), jnp.float32),
    )


def init_stgcn_params(key, A, num_classes, in_channels=3, base_channels=16,
                      ch_ratio=2, num_stages=4, inflate_stages=(3,), down_stages=(3,)):
    K, V, _ = A.shape
    keys = iter(jax.random.split(key, 256))
    params = {'A': A, 'data_bn': bn_init(next(keys), in_channels * V)}   # data_bn_type='VC'

    # replicate the channel / stride schedule from STGCN.__init__
    stage_cfgs = []
    base0 = base_channels
    if in_channels != base_channels:
        stage_cfgs.append(dict(in_c=in_channels, out_c=base_channels, stride=1, residual=False))
    inflate_times = 0
    cur_base = base_channels
    for i in range(2, num_stages + 1):
        stride = 1 + (i in down_stages)
        in_c = cur_base
        if i in inflate_stages:
            inflate_times += 1
        out_c = int(base0 * ch_ratio ** inflate_times + EPS)
        cur_base = out_c
        stage_cfgs.append(dict(in_c=in_c, out_c=out_c, stride=stride, residual=True))

    blocks = []
    for cfg in stage_cfgs:
        ci, co, stride = cfg['in_c'], cfg['out_c'], cfg['stride']
        blk = dict(cfg)
        # unit_gcn (adaptive='importance', conv_pos='pre'): Conv2d(ci, K*co, 1) + BN2d(co)
        blk['gcn_w'] = 0.1 * jax.random.normal(next(keys), (K * co, ci), jnp.float32)
        blk['gcn_b'] = 0.05 * jax.random.normal(next(keys), (K * co,), jnp.float32)
        blk['gcn_PA'] = jnp.ones((K, V, V), jnp.float32)          # importance init == 1
        blk['gcn_bn'] = bn_init(next(keys), co)
        # unit_tcn: Conv2d(co, co, (9,1), stride=(s,1), pad=(4,0)) + BN2d(co)
        blk['tcn_w'] = 0.1 * jax.random.normal(next(keys), (9, co, co), jnp.float32)
        blk['tcn_b'] = 0.05 * jax.random.normal(next(keys), (co,), jnp.float32)
        blk['tcn_bn'] = bn_init(next(keys), co)
        # residual path unit_tcn(ci, co, kernel_size=1, stride) when shape changes
        if cfg['residual'] and (ci != co or stride != 1):
            blk['res_w'] = 0.1 * jax.random.normal(next(keys), (1, co, ci), jnp.float32)
            blk['res_b'] = 0.05 * jax.random.normal(next(keys), (co,), jnp.float32)
            blk['res_bn'] = bn_init(next(keys), co)
        blocks.append(blk)

    params['blocks'] = blocks
    params['fc_w'] = 0.1 * jax.random.normal(next(keys), (num_classes, cur_base), jnp.float32)
    params['fc_b'] = 0.05 * jax.random.normal(next(keys), (num_classes,), jnp.float32)
    return params


# ----------------------------------------------------------------------------
if __name__ == "__main__":
    key = jax.random.PRNGKey(0)
    k_x, k_p = jax.random.split(key)

    N, M, T, V, C = 2, 2, 8, 16, 3
    num_classes = 5

    A = build_graph_A(V)
    params = init_stgcn_params(k_p, A, num_classes, in_channels=C, base_channels=16,
                               ch_ratio=2, num_stages=4, inflate_stages=(3,), down_stages=(3,))

    forward = build_fused_stgcn(params, N, M, T, V, C, num_classes)

    x = jax.random.normal(k_x, (N, M, T, V, C), jnp.float32)
    logits = forward(x)
    jax.block_until_ready(logits)
    assert logits.shape == (N, num_classes) and logits.dtype == jnp.float32
    assert bool(jnp.all(jnp.isfinite(logits)))
    print("KERNEL_OK")
</pallas_src>

<mosaic_0001>
module attributes {stable_mosaic.version = 11 : i64} {
  func.func @k(%arg0: memref<8x128xf32, #tpu.memory_space<vmem>>, %arg1: memref<8x128xf32, #tpu.memory_space<vmem>>) attributes {dimension_semantics = [], scalar_prefetch = 0 : i64, scratch_operands = 0 : i64, tpu.core_type = #tpu.core_type<tc>} {
    %c0 = arith.constant 0 : index
    %c0_0 = arith.constant 0 : index
    %0 = vector.load %arg0[%c0, %c0_0] : memref<8x128xf32, #tpu.memory_space<vmem>>, vector<8x128xf32>
    %c3_i32 = arith.constant 3 : i32
    %1 = tpu.dynamic_rotate %0 by %c3_i32 dim 1 : vector<8x128xf32>, i32 -> vector<8x128xf32>
    %c0_1 = arith.constant 0 : index
    %c0_2 = arith.constant 0 : index
    %2 = vector.load %arg1[%c0_1, %c0_2] : memref<8x128xf32, #tpu.memory_space<vmem>>, vector<8x128xf32>
    tpu.vector_store %arg1[%c0_1, %c0_2], %1 {strides = array<i32>} : memref<8x128xf32, #tpu.memory_space<vmem>>, vector<8x128xf32>,
    return
  }
}

</mosaic_0001>

<bundles_post_ra>
// kernel: tpu_custom_call.1
= control target key start
LH: loop header
LB: loop body
LE: loop exit
PB: predicated region body
PF: predicated region fallthrough
CT: control target
= control target key end

     0   :  { %6 = vsyncpa [#allocation3], 0  ;;  %s106_s0 = inlined_call_operand.hbm [shape: f32[8,128], index: 0, kind: input, shape index: {}]   ;;  %s107_s1 = inlined_call_operand.hbm [shape: f32[8,128], index: 1, kind: output, shape index: {}]  }
   0x1   :  { %7 = vsyncpa [#allocation4], 0  ;;  %s87_s6 = smov [#allocation2]  }
   0x2   :  { %s14_s7 = sshll.u32 %s87_s6, 4  ;;  %s15_s7 = int_to_ptr.vmem [resolvable:$true] %s14_s7 }
   0x3   :  { %s51_s8 = scalar_lea.vmem %s15_s7, 128  ;;  %p56_p1 = scmp.lt.s32.totalorder %s15_s7, %s15_s7 }
   0x4   :  { %p52_p0 = scmp.ne.s32.totalorder %s15_s7, %s51_s8  ;;  %p57_p2 = scmp.lt.s32.totalorder %s51_s8, %s51_s8 }
   0x6   :  { %p58_p3 = por %p57_p2, %p56_p1 }
   0x8   :  { %p59_p4 = pnand %p58_p3, %p52_p0 }
   0xa   :  { %62 = shalt.err (!%p59_p4)
}
   0xb   :  { %17 = dma.hbm_to_vmem [thread:$0]  %s106_s0, 128, %s15_s7, [#allocation3]  }
   0xc   :  { %83 = dma.done.wait [#allocation3], 128  }
   0xd   :  { %84 = vsyncadd [#allocation3], 4294967168  ;;  %v21_v0 = vld [vmem:[#allocation2] sm:$0xff]  ;;  %s88_s11 = smov 3   ;;  %s89_s12 = smov [#allocation5]  }
   0xe   :  { %22 = vrot.lane.b32.xlu0 %v21_v0, %s88_s11  ;;  %s31_s13 = sshll.u32 %s89_s12, 4  ;;  %s32_s13 = int_to_ptr.vmem [resolvable:$true] %s31_s13 }
   0xf   :  { %s63_s14 = scalar_lea.vmem %s32_s13, 128  ;;  %p68_p6 = scmp.lt.s32.totalorder %s32_s13, %s32_s13 }
  0x10   :  { %p64_p5 = scmp.ne.s32.totalorder %s32_s13, %s63_s14  ;;  %p69_p7 = scmp.lt.s32.totalorder %s63_s14, %s63_s14 }
  0x12   :  { %p70_p8 = por %p69_p7, %p68_p6 }
  0x14   :  { %p71_p9 = pnand %p70_p8, %p64_p5 }
  0x80   :  { %v23_v1 = vpop.permute.xlu0 %22 }
  0x81   :  { %24 = vst [vmem:[#allocation5] sm:$0xff] %v23_v1 }
  0x82   :  { %74 = shalt.err (!%p71_p9)
}
  0x83   :  { %34 = dma.vmem_to_hbm [thread:$0]  %s32_s13, 128, %s107_s1, [#allocation4]  }
  0x84   :  { %85 = dma.done.wait [#allocation4], 128  }
  0x85   :  { %86 = vsyncadd [#allocation4], 4294967168 }
  0x86   :  { %38 = vsyncpa [#allocation3], 1 }
  0x87   :  { %39 = vsyncpa [#allocation4], 1 }

</bundles_post_ra>
